<compile_context>
chip_gen: v6e
topology: v6e:2x2x1
jax: 0.10.0
libtpu: 0.0.40
codegen_flags: <defaults>
</compile_context>

<pallas_src>
import functools

import jax
import jax.numpy as jnp
from jax.experimental import pallas as pl
from jax.experimental.pallas import tpu as pltpu

LANE = 128    # lane width of every packed slab
GP = 8        # padded pooled-row count per step (full sublane tile)
XW = 8        # node-feature width padded to a sublane multiple


# ----------------------------- Pallas kernel --------------------------------
def gcn_kernel(act_ref, w_ref, out_ref, *, n2, offsets):
    """One grid step = `pb` fused graph-batches (block-diagonal adjacency)."""
    r1, r2, r3, r4, rb = offsets

    act = act_ref[0]                       # [n2 + GP, 128] activation slab
    w = w_ref[...]                         # [400, 128]    weight/bias slab

    # Static slices out of the packed slabs (row offsets are multiples of 8).
    a = act[0:n2, 0:n2]                    # block-diag D^-1/2 (A+I) D^-1/2
    x = act[0:n2, n2:n2 + XW]              # stacked node features (zero-padded)
    pa = act[n2:n2 + GP, 0:n2]             # block-diag (pool @ A_hat), zero-padded rows

    w1 = w[r1:r1 + XW, :]                  # [8, 128]   (rows >= F, lanes >= H zero)
    w2 = w[r2:r2 + LANE, :]                # [128, 128] (rows/lanes >= H zero)
    w3 = w[r3:r3 + LANE, :]
    wl = w[r4:r4 + LANE, :]                # [128, 128] (lanes >= C zero)
    b1 = w[rb + 0:rb + 1, :]
    b2 = w[rb + 1:rb + 2, :]
    b3 = w[rb + 2:rb + 3, :]
    bl = w[rb + 3:rb + 4, :]

    # conv1 — reassociated: (A @ X) @ W1 contracts through F first (F << H).
    h = jnp.dot(jnp.dot(a, x, preferred_element_type=jnp.float32), w1,
                preferred_element_type=jnp.float32) + b1
    h = jnp.maximum(h, 0.0)                # [n2, 128] lane-dense

    # conv2: A @ (H @ W2) + b2 ; relu
    h = jnp.dot(a, jnp.dot(h, w2, preferred_element_type=jnp.float32),
                preferred_element_type=jnp.float32) + b2
    h = jnp.maximum(h, 0.0)

    # conv3 + global_mean_pool folded: g = (P @ A) @ (H @ W3) + b3
    # (each pool row sums to 1, so the conv3 bias commutes through the mean).
    g = jnp.dot(pa, jnp.dot(h, w3, preferred_element_type=jnp.float32),
                preferred_element_type=jnp.float32) + b3   # [GP, 128]

    # F.dropout(p=0.5, training=False) -> identity in eval mode.
    # TODO(synk): training-mode dropout (pltpu.prng_* mask) not emitted here.

    # lin: full (8, 128) lane-dense output tile; wrapper slices valid rows/cols.
    out_ref[0] = jnp.dot(g, wl, preferred_element_type=jnp.float32) + bl


# ----------------------------- packing helpers -------------------------------
def pack_params(params):
    """Pack (w1,b1,w2,b2,w3,b3,wl,bl) into one lane-dense f32 [400,128] slab.

    W2/W3/Wlin get 128 contraction rows so in-kernel intermediates stay
    [*, 128] lane-dense and no lane slicing of weights is needed.
    """
    w1, b1, w2, b2, w3, b3, wl, bl = params
    F, H = w1.shape
    C = wl.shape[1]
    r1 = 0
    r2 = r1 + XW
    r3 = r2 + LANE
    r4 = r3 + LANE
    rb = r4 + LANE
    rows = rb + 8

    slab = jnp.zeros((rows, LANE), jnp.float32)
    slab = slab.at[r1:r1 + F, :H].set(w1)
    slab = slab.at[r2:r2 + H, :H].set(w2)
    slab = slab.at[r3:r3 + H, :H].set(w3)
    slab = slab.at[r4:r4 + H, :C].set(wl)
    slab = slab.at[rb + 0, :H].set(b1.reshape(-1))
    slab = slab.at[rb + 1, :H].set(b2.reshape(-1))
    slab = slab.at[rb + 2, :H].set(b3.reshape(-1))
    slab = slab.at[rb + 3, :C].set(bl.reshape(-1))
    return slab, (r1, r2, r3, r4, rb)


def build_act_slabs(x, a_hat, pool, num_steps):
    """Fuse `pb = B // num_steps` graph-batches per grid step into one
    lane-dense [n2+GP, 128] slab: block-diag A, stacked X, block-diag PA."""
    B, N, F = x.shape
    G = pool.shape[1]
    pb = B // num_steps
    n2 = pb * N
    assert n2 + XW <= LANE and pb * G <= GP, "fused block exceeds one lane tile"
    rows = n2 + GP

    x = x.astype(jnp.float32)                      # x = x.float()
    pa = jnp.einsum('bgn,bnm->bgm', pool, a_hat)   # fold mean-pool into conv3

    act = jnp.zeros((num_steps, rows, LANE), jnp.float32)
    for s in range(num_steps):
        for j in range(pb):
            b = s * pb + j
            r0 = j * N
            act = act.at[s, r0:r0 + N, r0:r0 + N].set(a_hat[b])
            act = act.at[s, r0:r0 + N, n2:n2 + F].set(x[b])
            act = act.at[s, n2 + j * G:n2 + (j + 1) * G, r0:r0 + N].set(pa[b])
    return act, n2, pb


# ----------------------------- wrapper ---------------------------------------
def gcn_forward(x, a_hat, pool, w_slab, offsets, *, num_classes, num_steps=2):
    """x: [B,N,F] (any numeric dtype), a_hat: [B,N,N], pool: [B,G,N].

    num_steps=2 keeps both v7x TensorCores busy via the 'parallel' grid axis;
    on single-TC v5e/v6e the extra step costs only ~0.35 us.
    """
    B, N, F = x.shape
    G = pool.shape[1]
    assert B % num_steps == 0, "B must divide evenly into grid steps"

    act, n2, pb = build_act_slabs(x, a_hat, pool, num_steps)
    rows = act.shape[1]

    kernel = functools.partial(gcn_kernel, n2=n2, offsets=offsets)

    flops_step = 2 * (n2 * n2 * XW + n2 * XW * LANE        # conv1
                      + n2 * LANE * LANE + n2 * n2 * LANE  # conv2
                      + n2 * LANE * LANE + GP * n2 * LANE  # conv3 + pool
                      + GP * LANE * LANE)                  # lin
    flops = int(flops_step * num_steps)
    bytes_accessed = int(4 * (act.size + w_slab.size + num_steps * GP * LANE))

    out = pl.pallas_call(
        kernel,
        out_shape=jax.ShapeDtypeStruct((num_steps, GP, LANE), jnp.float32),
        grid=(num_steps,),
        in_specs=[
            pl.BlockSpec((1, rows, LANE), lambda s: (s, 0, 0)),
            pl.BlockSpec(w_slab.shape, lambda s: (0, 0)),
        ],
        out_specs=pl.BlockSpec((1, GP, LANE), lambda s: (s, 0, 0)),
        compiler_params=pltpu.CompilerParams(
            dimension_semantics=("parallel",)),
        cost_estimate=pl.CostEstimate(
            flops=flops, transcendentals=0, bytes_accessed=bytes_accessed),
    )(act, w_slab)

    # [steps, GP, 128] -> valid pooled rows -> [B, G, num_classes]
    out = out[:, :pb * G, :].reshape(B, G, LANE)
    return out[:, :, :num_classes]


# ----------------------------- glue / setup ----------------------------------
def build_normalized_adjacency(edge_index, num_nodes):
    """Dense GCN-normalized adjacency with self-loops: D^-1/2 (A+I) D^-1/2.
    NOTE: duplicate edges are de-duplicated here (simple undirected graph);
    PyG's gcn_norm would sum duplicate edge weights for multigraphs."""
    src, dst = edge_index
    a = jnp.zeros((num_nodes, num_nodes), jnp.float32)
    a = a.at[dst, src].set(1.0)
    a = a.at[src, dst].set(1.0)                      # undirected graph
    a = a + jnp.eye(num_nodes, dtype=jnp.float32)    # self-loops
    a = jnp.minimum(a, 1.0)
    deg = a.sum(axis=1)
    d_inv_sqrt = jnp.where(deg > 0, 1.0 / jnp.sqrt(deg), 0.0)
    return d_inv_sqrt[:, None] * a * d_inv_sqrt[None, :]


def build_pool_matrix(batch, num_graphs):
    """[G, N] matrix averaging node features per graph (global_mean_pool)."""
    onehot = (batch[None, :] == jnp.arange(num_graphs)[:, None]).astype(jnp.float32)
    counts = jnp.maximum(onehot.sum(axis=1, keepdims=True), 1.0)
    return onehot / counts


def glorot(key, shape):
    fan_in, fan_out = shape
    lim = jnp.sqrt(6.0 / (fan_in + fan_out))
    return jax.random.uniform(key, shape, jnp.float32, -lim, lim)


if __name__ == "__main__":
    # num_node_features=4, hidden=32, num_classes=4; B=4 independent
    # graph-batches, each with N=16 nodes split into G=2 graphs.
    N, F, H, C, G, B = 16, 4, 32, 4, 2, 4

    key = jax.random.PRNGKey(0)
    kp, kd = jax.random.split(key)
    k1, k2, k3, k4 = jax.random.split(kp, 4)

    # Deterministic parameters (GCNConv: glorot weight + zero bias).
    w1 = glorot(k1, (F, H)); b1 = jnp.zeros((1, H), jnp.float32)
    w2 = glorot(k2, (H, H)); b2 = jnp.zeros((1, H), jnp.float32)
    w3 = glorot(k3, (H, H)); b3 = jnp.zeros((1, H), jnp.float32)
    wl = glorot(k4, (H, C)); bl = jnp.zeros((1, C), jnp.float32)
    params = (w1, b1, w2, b2, w3, b3, wl, bl)
    w_slab, offsets = pack_params(params)

    # B independent graph-batches (random edges), batch vec: 8 nodes / graph.
    E = 24
    batch = jnp.concatenate([jnp.zeros(N // 2, jnp.int32),
                             jnp.ones(N - N // 2, jnp.int32)])
    xs, a_hats, pools = [], [], []
    for i in range(B):
        kb = jax.random.fold_in(kd, i)
        kx, ks, kt = jax.random.split(kb, 3)
        xs.append(jax.random.randint(kx, (N, F), 0, 5).astype(jnp.int32))
        src = jax.random.randint(ks, (E,), 0, N)
        dst = jax.random.randint(kt, (E,), 0, N)
        a_hats.append(build_normalized_adjacency(jnp.stack([src, dst]), N))
        pools.append(build_pool_matrix(batch, G))
    x = jnp.stack(xs)
    a_hat = jnp.stack(a_hats)
    pool = jnp.stack(pools)

    out = gcn_forward(x, a_hat, pool, w_slab, offsets,
                      num_classes=C, num_steps=2)
    out = jax.block_until_ready(out)

    # pure-JAX reference (original association, unfused), per batch element.
    def ref_one(xb, ab, pb):
        h = xb.astype(jnp.float32)
        h = jnp.maximum(ab @ (h @ w1) + b1, 0.0)
        h = jnp.maximum(ab @ (h @ w2) + b2, 0.0)
        h = ab @ (h @ w3) + b3
        return (pb @ h) @ wl + bl

    ref = jnp.stack([ref_one(x[i], a_hat[i], pool[i]) for i in range(B)])

    assert out.shape == (B, G, C)
    assert jnp.allclose(out, ref, atol=1e-4, rtol=1e-4), \
        float(jnp.abs(out - ref).max())
    print("KERNEL_OK")
</pallas_src>

<mosaic_0001>
module attributes {stable_mosaic.version = 11 : i64} {
  func.func @gcn_kernel(%arg0: i32, %arg1: memref<1x40x128xf32, #tpu.memory_space<vmem>>, %arg2: memref<400x128xf32, #tpu.memory_space<vmem>>, %arg3: memref<1x8x128xf32, #tpu.memory_space<vmem>>) attributes {dimension_semantics = [#tpu.dimension_semantics<parallel>], iteration_bounds = array<i64: 2>, scalar_prefetch = 0 : i64, scratch_operands = 0 : i64, tpu.core_type = #tpu.core_type<tc>, window_params = [{transform_indices = @transform_0, window_bounds = array<i64: 1, 40, 128>}, {pipeline_mode = #tpu.pipeline_mode<synchronous>, transform_indices = @transform_1, window_bounds = array<i64: 400, 128>}, {transform_indices = @transform_2, window_bounds = array<i64: 1, 8, 128>}]} {
    %c0 = arith.constant 0 : index
    %c0_0 = arith.constant 0 : index
    %c0_1 = arith.constant 0 : index
    %0 = vector.load %arg1[%c0, %c0_0, %c0_1] : memref<1x40x128xf32, #tpu.memory_space<vmem>>, vector<1x40x128xf32>
    %1 = vector.shape_cast %0 : vector<1x40x128xf32> to vector<40x128xf32>
    %c0_2 = arith.constant 0 : index
    %c0_3 = arith.constant 0 : index
    %2 = vector.load %arg2[%c0_2, %c0_3] : memref<400x128xf32, #tpu.memory_space<vmem>>, vector<400x128xf32>
    %3 = vector.extract_strided_slice %1 {offsets = [0, 0], sizes = [32, 32], strides = [1, 1]} : vector<40x128xf32> to vector<32x32xf32>
    %4 = vector.extract_strided_slice %1 {offsets = [0, 32], sizes = [32, 8], strides = [1, 1]} : vector<40x128xf32> to vector<32x8xf32>
    %5 = vector.extract_strided_slice %1 {offsets = [32, 0], sizes = [8, 32], strides = [1, 1]} : vector<40x128xf32> to vector<8x32xf32>
    %6 = vector.extract_strided_slice %2 {offsets = [0, 0], sizes = [8, 128], strides = [1, 1]} : vector<400x128xf32> to vector<8x128xf32>
    %7 = vector.extract_strided_slice %2 {offsets = [8, 0], sizes = [128, 128], strides = [1, 1]} : vector<400x128xf32> to vector<128x128xf32>
    %8 = vector.extract_strided_slice %2 {offsets = [136, 0], sizes = [128, 128], strides = [1, 1]} : vector<400x128xf32> to vector<128x128xf32>
    %9 = vector.extract_strided_slice %2 {offsets = [264, 0], sizes = [128, 128], strides = [1, 1]} : vector<400x128xf32> to vector<128x128xf32>
    %10 = vector.extract_strided_slice %2 {offsets = [392, 0], sizes = [1, 128], strides = [1, 1]} : vector<400x128xf32> to vector<1x128xf32>
    %11 = vector.extract_strided_slice %2 {offsets = [393, 0], sizes = [1, 128], strides = [1, 1]} : vector<400x128xf32> to vector<1x128xf32>
    %12 = vector.extract_strided_slice %2 {offsets = [394, 0], sizes = [1, 128], strides = [1, 1]} : vector<400x128xf32> to vector<1x128xf32>
    %13 = vector.extract_strided_slice %2 {offsets = [395, 0], sizes = [1, 128], strides = [1, 1]} : vector<400x128xf32> to vector<1x128xf32>
    %cst = arith.constant dense<0.000000e+00> : vector<32x8xf32>
    %14 = tpu.matmul %3, %4, %cst {dimension_numbers = #tpu.dot_dimension_numbers<[1], [0], [0], [1], [0, 0, 1, 1], [], []>} : vector<32x32xf32>, vector<32x8xf32>, vector<32x8xf32> -> vector<32x8xf32>
    %cst_4 = arith.constant dense<0.000000e+00> : vector<32x128xf32>
    %15 = tpu.matmul %14, %6, %cst_4 {dimension_numbers = #tpu.dot_dimension_numbers<[1], [0], [0], [1], [0, 0, 1, 1], [], []>} : vector<32x8xf32>, vector<8x128xf32>, vector<32x128xf32> -> vector<32x128xf32>
    %16 = vector.broadcast %10 : vector<1x128xf32> to vector<32x128xf32>
    %17 = arith.addf %15, %16 : vector<32x128xf32>
    %cst_5 = arith.constant 0.000000e+00 : f32
    %18 = vector.broadcast %cst_5 : f32 to vector<32x128xf32>
    %19 = arith.maximumf %17, %18 : vector<32x128xf32>
    %cst_6 = arith.constant dense<0.000000e+00> : vector<32x128xf32>
    %20 = tpu.matmul %19, %7, %cst_6 {dimension_numbers = #tpu.dot_dimension_numbers<[1], [0], [0], [1], [0, 0, 1, 1], [], []>} : vector<32x128xf32>, vector<128x128xf32>, vector<32x128xf32> -> vector<32x128xf32>
    %cst_7 = arith.constant dense<0.000000e+00> : vector<32x128xf32>
    %21 = tpu.matmul %3, %20, %cst_7 {dimension_numbers = #tpu.dot_dimension_numbers<[1], [0], [0], [1], [0, 0, 1, 1], [], []>} : vector<32x32xf32>, vector<32x128xf32>, vector<32x128xf32> -> vector<32x128xf32>
    %22 = vector.broadcast %11 : vector<1x128xf32> to vector<32x128xf32>
    %23 = arith.addf %21, %22 : vector<32x128xf32>
    %cst_8 = arith.constant 0.000000e+00 : f32
    %24 = vector.broadcast %cst_8 : f32 to vector<32x128xf32>
    %25 = arith.maximumf %23, %24 : vector<32x128xf32>
    %cst_9 = arith.constant dense<0.000000e+00> : vector<32x128xf32>
    %26 = tpu.matmul %25, %8, %cst_9 {dimension_numbers = #tpu.dot_dimension_numbers<[1], [0], [0], [1], [0, 0, 1, 1], [], []>} : vector<32x128xf32>, vector<128x128xf32>, vector<32x128xf32> -> vector<32x128xf32>
    %cst_10 = arith.constant dense<0.000000e+00> : vector<8x128xf32>
    %27 = tpu.matmul %5, %26, %cst_10 {dimension_numbers = #tpu.dot_dimension_numbers<[1], [0], [0], [1], [0, 0, 1, 1], [], []>} : vector<8x32xf32>, vector<32x128xf32>, vector<8x128xf32> -> vector<8x128xf32>
    %28 = vector.broadcast %12 : vector<1x128xf32> to vector<8x128xf32>
    %29 = arith.addf %27, %28 : vector<8x128xf32>
    %cst_11 = arith.constant dense<0.000000e+00> : vector<8x128xf32>
    %30 = tpu.matmul %29, %9, %cst_11 {dimension_numbers = #tpu.dot_dimension_numbers<[1], [0], [0], [1], [0, 0, 1, 1], [], []>} : vector<8x128xf32>, vector<128x128xf32>, vector<8x128xf32> -> vector<8x128xf32>
    %31 = vector.broadcast %13 : vector<1x128xf32> to vector<8x128xf32>
    %32 = arith.addf %30, %31 : vector<8x128xf32>
    %c0_12 = arith.constant 0 : index
    %c0_13 = arith.constant 0 : index
    %c0_14 = arith.constant 0 : index
    %33 = vector.load %arg3[%c0_12, %c0_13, %c0_14] : memref<1x8x128xf32, #tpu.memory_space<vmem>>, vector<1x8x128xf32>
    %34 = vector.shape_cast %33 : vector<1x8x128xf32> to vector<8x128xf32>
    %35 = vector.shape_cast %32 : vector<8x128xf32> to vector<1x8x128xf32>
    tpu.vector_store %arg3[%c0_12, %c0_13, %c0_14], %35 {strides = array<i32>} : memref<1x8x128xf32, #tpu.memory_space<vmem>>, vector<1x8x128xf32>,
    return
  }
  func.func @transform_0(%arg0: i32) -> (i32, i32, i32) {
    %c0_i32 = arith.constant 0 : i32
    %c0_i32_0 = arith.constant 0 : i32
    %c0_i32_1 = arith.constant 0 : i32
    return %arg0, %c0_i32, %c0_i32_0 : i32, i32, i32
  }
  func.func @transform_1(%arg0: i32) -> (i32, i32) {
    %c0_i32 = arith.constant 0 : i32
    %c0_i32_0 = arith.constant 0 : i32
    %c0_i32_1 = arith.constant 0 : i32
    return %c0_i32, %c0_i32_0 : i32, i32
  }
  func.func @transform_2(%arg0: i32) -> (i32, i32, i32) {
    %c0_i32 = arith.constant 0 : i32
    %c0_i32_0 = arith.constant 0 : i32
    %c0_i32_1 = arith.constant 0 : i32
    return %arg0, %c0_i32, %c0_i32_0 : i32, i32, i32
  }
}

</mosaic_0001>

<bundles_post_ra>
// kernel: tpu_custom_call.1
= control target key start
LH: loop header
LB: loop body
LE: loop exit
PB: predicated region body
PF: predicated region fallthrough
CT: control target
= control target key end

     0   :  { %7 = vsyncpa [#allocation3], 0  ;;  %s1659_s0 = inlined_call_operand.hbm [shape: f32[2,40,128], index: 0, kind: input, shape index: {}]   ;;  %s1660_s1 = inlined_call_operand.hbm [shape: f32[400,128], index: 1, kind: input, shape index: {}]   ;;  %s1661_s2 = inlined_call_operand.hbm [shape: f32[2,8,128], index: 2, kind: output, shape index: {}]  }
   0x1   :  { %9 = vsyncpa [#allocation3 + $0x1], 0 }
   0x2   :  { %10 = vsyncpa [#allocation6], 0 }
   0x3   :  { %11 = vsyncpa [#allocation4], 0 }
   0x4   :  { %13 = vsyncpa [#allocation4 + $0x1], 0  ;;  %s1435_s9 = smov 0   ;;  %s1437_s10 = smov 0  }
   0x5   :  { %s1439_s11 = smov 0   ;;  %s1441_s12 = smov 0  }
   0x6 LB: > { %s1456_s13 = sadd.s32 4294967295, %s1410_s12   ;;  %s957_s14 = sadd.s32 4294967294, %s1410_s12   ;;  %s1410_s12 = sphi %s1441_s12, %s1683_s12   ;;  %s1406_s11 = sphi %s1439_s11, %s1682_s11   ;;  %s1402_s10 = sphi %s1437_s10, %s1681_s10   ;;  %s1398_s9 = sphi %s1435_s9, %s1680_s9  }
   0x7   : > { %p39_p0 = scmp.ne.s32.totalorder %s1402_s10, %s1398_s9  ;;  %p1662_p1 = scmp.eq.s32.totalorder %s1456_s13, 0 }
   0x8   : > { %p90_p3 = scmp.eq.s32.totalorder %s957_s14, 1  ;;  %p958_p5 = scmp.ge.s32.totalorder %s1410_s12, 1 }
   0x9   : > { %p1465_p4 = por %p1662_p1, %p39_p0  ;;  %p97_p7 = scmp.lt.s32.totalorder %s1410_s12, 3 }
   0xa   : > { %p1470_p6 = por %p90_p3, %p39_p0  ;;  %s1412_s18 = smov [#allocation5]  }
   0xb   : > { %s1666_s15 = scalar_select %p1465_p4, 1, 0 }
   0xc   : > { %s1667_s16 = scalar_select %p1470_p6, 1, 0 }
   0xd   : > { %p1475_p8 = pnand %p958_p5, %p97_p7  ;;  %s109_s19 = sshll.u32 %s1412_s18, 4  ;;  %s110_s19 = int_to_ptr.vmem [resolvable:$true] %s109_s19 }
   0xe   : > { %s1489_s21 = sadd.s32 1, %s1410_s12   ;;  %s26_s22 = sadd.s32 1, %s1406_s11 }
   0xf   : > { %s1668_s17 = scalar_select %p1475_p8, 1, 0 }
  0x10   : > { %p1234_p9 = pneg %p1475_p8  ;;  %s23_s23 = ssub.s32 %s1410_s12, %s1489_s21 }
  0x11   : > { %s1299_s24 = scalar_lea.vmem %s110_s19, 6400  ;;  %p1307_p5 = scmp.lt.s32.totalorder %s110_s19, %s110_s19 }
  0x12   : > { %p1484_p11 = pnand %p1234_p9, %p1662_p1  ;;  %p1300_p13 = scmp.ne.s32.totalorder %s110_s19, %s1299_s24 }
  0x13   : > { %p1308_p7 = scmp.lt.s32.totalorder %s1299_s24, %s1299_s24 }
  0x14   : > { %p1290_p12 = pneg %p1484_p11 }
  0x15   : > { %p1309_p10 = por %p1308_p7, %p1307_p5 }
  0x16   : > { %p1302_p0 = pnand %p1300_p13, %p1290_p12 }
  0x18   : > { %p1303_p3 = pneg %p1302_p0 }
  0x1a   : > { %p1310_p2 = pnand %p1309_p10, %p1303_p3 }
  0x1c   : > { %1313 = shalt.err (!%p1310_p2)
}
  0x1d   : > { %s1413_s25 = smov 128   ;;  %s1414_s26 = smov 8  }
  0x1e   : > { %1237 = dma.hbm_to_vmem [thread:$0]  (!%p1484_p11), %s1660_s1, 6400, %s110_s19, [#allocation6], %s1413_s25, %s1413_s25, %s1414_s26  }
  0x1f   : > { %p24_p2 = scmp.eq.s32.totalorder %s23_s23, 0  ;;  %p33_p9 = scmp.ne.s32.totalorder %s1406_s11, %s1402_s10 }
  0x20   : > { %p34_p10 = scmp.eq.s32.totalorder %s1410_s12, 0  ;;  %p1247_p12 = scmp.lt.s32.totalorder %s1410_s12, 2 }
  0x21   : > { %s1509_s29 = scalar_select %p24_p2, %s1406_s11, %s26_s22  }
  0x22   : > { %p35_p13 = por %p34_p10, %p33_p9  ;;  %p1670_p0 = scmp.eq.s32.totalorder %s1456_s13, 1 }
  0x23   : > { %s123_s3 = sand.u32 1, %s1406_s11   ;;  %s1224_s4 = smul.u32 640, %s1410_s12 }
  0x24   : > { %p1513_p3 = por %p1670_p0, %p33_p9  ;;  %s1223_s5 = smul.u32 40, %s123_s3 }
  0x25   : > { %p1519_p5 = pnand %p1247_p12, %p35_p13  ;;  %s1526_s14 = scalar_lea.hbm %s1659_s0, %s1224_s4 }
  0x26   : > { %s1671_s30 = scalar_select %p1513_p3, 1, 0 }
  0x27   : > { %s127_s18 = scalar_lea.vmem [#allocation2], %s1223_s5  ;;  %s1530_s20 = scalar_lea.sflag [#allocation3], %s123_s3 }
  0x28   : > { %s134_s19 = sshll.u32 %s127_s18, 4  ;;  %s1314_s22 = scalar_lea.hbm %s1526_s14, 640  ;;  %s1528_s19 = int_to_ptr.vmem [resolvable:$true] %s134_s19 }
  0x29   : > { %p1315_p11 = scmp.ne.s32.totalorder %s1526_s14, %s1314_s22  ;;  %p1316_p7 = pneg %p1519_p5 }
  0x2a   : > { %s1319_s27 = scalar_lea.hbm %s1659_s0, 1280  ;;  %p1320_p10 = scmp.lt.s32.totalorder %s1526_s14, %s1659_s0 }
  0x2b   : > { %p1317_p2 = pnand %p1316_p7, %p1315_p11  ;;  %p1321_p12 = scmp.lt.s32.totalorder %s1319_s27, %s1314_s22 }
  0x2d   : > { %p1318_p9 = pneg %p1317_p2  ;;  %p1322_p13 = por %p1321_p12, %p1320_p10 }
  0x2f   : > { %p1323_p0 = pnand %p1322_p13, %p1318_p9 }
  0x31   : > { %1326 = shalt.err (!%p1323_p0)
}
  0x32   : > { %s1327_s3 = scalar_lea.vmem %s1528_s19, 640  ;;  %s1415_s5 = smov [#allocation2]  }
  0x33   : > { %p1328_p1 = scmp.ne.s32.totalorder %s1528_s19, %s1327_s3  ;;  %s1332_s7 = sshll.u32 %s1415_s5, 4  ;;  %s1333_s7 = int_to_ptr.vmem [resolvable:$false] %s1332_s7 }
  0x34   : > { %s1334_s8 = scalar_lea.vmem %s1333_s7, 1280  ;;  %p1335_p2 = scmp.lt.s32.totalorder %s1528_s19, %s1333_s7 }
  0x35   : > { %p1330_p6 = pnand %p1328_p1, %p1316_p7  ;;  %p1336_p3 = scmp.lt.s32.totalorder %s1334_s8, %s1327_s3 }
  0x37   : > { %p1331_p11 = pneg %p1330_p6  ;;  %p1337_p4 = por %p1336_p3, %p1335_p2 }
  0x39   : > { %p1338_p8 = pnand %p1337_p4, %p1331_p11 }
  0x3b   : > { %1341 = shalt.err (!%p1338_p8)
}
  0x3c   : > { %1241 = dma.hbm_to_vmem [thread:$0]  (!%p1519_p5), %s1526_s14, 640, %s1528_s19, %s1530_s20, %s1413_s25, %s1413_s25, %s1414_s26  }
  0x3d   : > { %p1673_p1 = scmp.ne.s32.totalorder %s1668_s17, 0 }
  0x3e   : > { %s1557_s18 = sand.u32 (!%p1673_p1), 1, %s1402_s10   ;;  %p1674_p4 = scmp.ne.s32.totalorder (!%p1673_p1), %s1666_s15, 0 }
  0x3f   : > { %146 = sbr.rel (%p1673_p1) target bundleno = 1606 (0x646), region = 28  ;;  %s149_s23 = scalar_lea.sflag (!%p1673_p1), [#allocation3], %s1557_s18 }
  0x40   : > { %s1225_s22 = smul.u32 (!%p1673_p1), 40, %s1557_s18 }
  0x42   : > { %s1561_s24 = scalar_lea.vmem (!%p1673_p1), [#allocation2], %s1225_s22 }
  0x44   : > { %1385 = dma.done.wait (%p1674_p4), %s149_s23, 640  }
  0x45   : > { %1387 = vsyncadd (%p1674_p4), %s149_s23, 4294966656  ;;  %p1675_p6 = scmp.eq.s32.totalorder %s1456_s13, 0 }
  0x47   : > { %1389 = dma.done.wait (%p1675_p6), [#allocation6], 6400   ;;  %p1676_p8 = pmov %p1675_p6 }
  0x48   : > { %vm248_vm0 = vcmask 261120   ;;  %v1572_v0 = vld [vmem:[%s1561_s24 + $0x18] sm:$0xff]  ;;  %v1575_v1 = vld [vmem:[%s1561_s24 + $0x8] sm:$0xff]  ;;  %s1416_s17 = smov 96   ;;  %v1580_v2 = vld [vmem:[%s1561_s24] sm:$0xff]  ;;  %vm346_vm1 = vcmask 64512   ;;  %v342_v29 = vlaneseq }
  0x49   : > { %1391 = vsyncadd (%p1676_p8), [#allocation6], 4294960896  ;;  %242 = vrot.lane.b32.xlu0 %v1572_v0, %s1416_s17  ;;  %238 = vrot.lane.b32.xlu1 %v1575_v1, %s1416_s17  ;;  %v1583_v3 = vld [vmem:[%s1561_s24 + $0x10] sm:$0xff]  ;;  %v197_v10 = vld [vmem:[#allocation5 + $0x78] sm:$0xff]  ;;  %vm1418_vm2 = vmmov 0   ;;  %s964_s15 = sshll.u32 %s1557_s18, 3 }
  0x4a   : > { %1073 = vmatprep.mubr.msk.f32.mxu0 %vm248_vm0, %v1580_v2  ;;  %v182_v8 = vld [vmem:[#allocation5] sm:$0xff]  ;;  %v196_v11 = vld [vmem:[#allocation5 + $0x70] sm:$0xff]  ;;  %v195_v12 = vld [vmem:[#allocation5 + $0x68] sm:$0xff]  ;;  %v1597_v30 = vshrl.u32 %v342_v29, 7  ;;  %s979_s25 = sshll.u32 %s1456_s13, 7  ;;  %s176_s26 = scalar_lea.vmem [#allocation7], %s964_s15 }
  0x4b   : > { %v198_v9 = vld [vmem:[#allocation5 + $0x80] sm:$0xff]  ;;  %v193_v14 = vld [vmem:[#allocation5 + $0x58] sm:$0xff]  ;;  %v192_v15 = vld [vmem:[#allocation5 + $0x50] sm:$0xff]  ;;  %s877_s6 = sshll.u32 %s176_s26, 4  ;;  %s1622_s20 = scalar_lea.hbm %s1661_s2, %s979_s25  ;;  %s878_s6 = int_to_ptr.vmem [resolvable:$true] %s877_s6 }
  0x4c   : > { %1087 = vmatprep.subr.mxu1 %v198_v9  ;;  %v194_v13 = vld [vmem:[#allocation5 + $0x60] sm:$0xff]  ;;  %v191_v16 = vld [vmem:[#allocation5 + $0x48] sm:$0xff]  ;;  %v189_v18 = vld [vmem:[#allocation5 + $0x38] sm:$0xff]  ;;  %v344_v31 = vsub.s32 0, %v1597_v30  ;;  %s864_s27 = scalar_lea.sflag [#allocation4], %s1557_s18  ;;  %s1342_s28 = scalar_lea.vmem %s878_s6, 128 }
  0x4d   : > { %240 = vrot.lane.b32.xlu0 %v1583_v3, %s1416_s17  ;;  %236 = vrot.lane.b32.xlu1 %v1580_v2, %s1416_s17  ;;  %v190_v17 = vld [vmem:[#allocation5 + $0x40] sm:$0xff]  ;;  %v188_v19 = vld [vmem:[#allocation5 + $0x30] sm:$0xff]  ;;  %v187_v20 = vld [vmem:[#allocation5 + $0x28] sm:$0xff]  ;;  %p1343_p3 = scmp.ne.s32.totalorder %s878_s6, %s1342_s28  ;;  %p1677_p5 = scmp.ne.s32.totalorder %s1671_s30, 0 }
  0x4e   : > { %1088 = vmatpush3.msra.mxu1 %v198_v9  ;;  %v186_v25 = vld [vmem:[#allocation5 + $0x20] sm:$0xff]  ;;  %v185_v26 = vld [vmem:[#allocation5 + $0x18] sm:$0xff]  ;;  %v184_v27 = vld [vmem:[#allocation5 + $0x10] sm:$0xff]  ;;  %s1419_s4 = smov [#allocation7]  }
  0x4f   : > { %1089 = vmatprep.subr.mxu1 %v197_v10  ;;  %v183_v28 = vld [vmem:[#allocation5 + $0x8] sm:$0xff]  ;;  %v214_v50 = vld [vmem:[#allocation5 + $0x100] sm:$0xff]  ;;  %v213_v51 = vld [vmem:[#allocation5 + $0xf8] sm:$0xff]  ;;  %p1344_p7 = pnand %p1343_p3, %p1677_p5  ;;  %s1346_s13 = sshll.u32 %s1419_s4, 4  ;;  %s1347_s13 = int_to_ptr.vmem [resolvable:$false] %s1346_s13 }
  0x50   : > { %1090 = vmatpush3.msra.mxu1 %v197_v10  ;;  %v1600_v32 = vld [vmem:[#allocation5 + $0x188] sm:$0xff]  ;;  %v212_v52 = vld [vmem:[#allocation5 + $0xf0] sm:$0xff]  ;;  %v210_v54 = vld [vmem:[#allocation5 + $0xe0] sm:$0xff]  ;;  %s1348_s3 = scalar_lea.vmem %s1347_s13, 256  ;;  %p1349_p10 = scmp.lt.s32.totalorder %s878_s6, %s1347_s13 }
  0x51   : > { %1091 = vmatprep.subr.mxu1 %v196_v11  ;;  %v345_v33 = vrot.slane %v1600_v32, %v344_v31  ;;  %v211_v53 = vld [vmem:[#allocation5 + $0xe8] sm:$0xff]  ;;  %v209_v55 = vld [vmem:[#allocation5 + $0xd8] sm:$0xff]  ;;  %v208_v56 = vld [vmem:[#allocation5 + $0xd0] sm:$0xff]  ;;  %p1345_p9 = pneg %p1344_p7  ;;  %p1350_p12 = scmp.lt.s32.totalorder %s1348_s3, %s1342_s28 }
  0x52   : > { %1092 = vmatpush3.msra.mxu1 %v196_v11  ;;  %v207_v57 = vld [vmem:[#allocation5 + $0xc8] sm:$0xff]  ;;  %v206_v58 = vld [vmem:[#allocation5 + $0xc0] sm:$0xff]  ;;  %v205_v59 = vld [vmem:[#allocation5 + $0xb8] sm:$0xff] }
  0x53   : > { %1093 = vmatprep.subr.mxu1 %v195_v12  ;;  %v204_v60 = vld [vmem:[#allocation5 + $0xb0] sm:$0xff]  ;;  %v203_v61 = vld [vmem:[#allocation5 + $0xa8] sm:$0xff]  ;;  %v202_v62 = vld [vmem:[#allocation5 + $0xa0] sm:$0xff]  ;;  %p1351_p13 = por %p1350_p12, %p1349_p10 }
  0x54   : > { %1094 = vmatpush3.msra.mxu1 %v195_v12  ;;  %v201_v63 = vld [vmem:[#allocation5 + $0x98] sm:$0xff]  ;;  %v218_v29 = vld [vmem:[#allocation5 + $0x120] sm:$0xff] }
  0x55   : > { %1095 = vmatprep.subr.mxu1 %v194_v13  ;;  %v217_v31 = vld [vmem:[#allocation5 + $0x118] sm:$0xff]  ;;  %p1352_p0 = pnand %p1351_p13, %p1345_p9 }
  0x56   : > { %1096 = vmatpush3.msra.mxu1 %v194_v13 }
  0x57   : > { %1097 = vmatprep.subr.mxu1 %v193_v14 }
  0x58   : > { %1098 = vmatpush3.msra.mxu1 %v193_v14 }
  0x59   : > { %1099 = vmatprep.subr.mxu1 %v192_v15 }
  0x5a   : > { %1100 = vmatpush3.msra.mxu1 %v192_v15 }
  0x5b   : > { %1101 = vmatprep.subr.mxu1 %v191_v16 }
  0x5c   : > { %1102 = vmatpush3.msra.mxu1 %v191_v16  ;;  %v1417_v16 = vmov 0.0  }
  0x5d   : > { %1103 = vmatprep.subr.mxu1 %v190_v17 }
  0x5e   : > { %1104 = vmatpush3.msra.mxu1 %v190_v17  ;;  %v230_v17 = vld [vmem:[#allocation5 + $0x180] sm:$0xff] }
  0x5f   : > { %1105 = vmatprep.subr.mxu1 %v189_v18 }
  0x60   : > { %1106 = vmatpush3.msra.mxu1 %v189_v18  ;;  %v229_v18 = vld [vmem:[#allocation5 + $0x178] sm:$0xff] }
  0x61   : > { %1107 = vmatprep.subr.mxu1 %v188_v19 }
  0x62   : > { %1108 = vmatpush3.msra.mxu1 %v188_v19  ;;  %v228_v19 = vld [vmem:[#allocation5 + $0x170] sm:$0xff] }
  0x63   : > { %1109 = vmatprep.subr.mxu1 %v187_v20 }
  0x64   : > { %1110 = vmatpush3.msra.mxu1 %v187_v20  ;;  %v227_v20 = vld [vmem:[#allocation5 + $0x168] sm:$0xff] }
  0x65   : > { %1111 = vmatprep.subr.mxu1 %v186_v25 }
  0x66   : > { %1112 = vmatpush3.msra.mxu1 %v186_v25  ;;  %v222_v25 = vld [vmem:[#allocation5 + $0x140] sm:$0xff] }
  0x67   : > { %1113 = vmatprep.subr.mxu1 %v185_v26 }
  0x68   : > { %1114 = vmatpush3.msra.mxu1 %v185_v26  ;;  %v221_v26 = vld [vmem:[#allocation5 + $0x138] sm:$0xff] }
  0x69   : > { %1115 = vmatprep.subr.mxu1 %v184_v27 }
  0x6a   : > { %1116 = vmatpush3.msra.mxu1 %v184_v27  ;;  %v220_v27 = vld [vmem:[#allocation5 + $0x130] sm:$0xff] }
  0x6b   : > { %1117 = vmatprep.subr.mxu1 %v183_v28 }
  0x6c   : > { %1118 = vmatpush3.msra.mxu1 %v183_v28  ;;  %v219_v28 = vld [vmem:[#allocation5 + $0x128] sm:$0xff] }
  0x6d   : > { %1188 = vmatprep.subr.mxu1 %v1417_v16 }
  0xbb   : > { %v243_v4 = vpop.permute.xlu0 %242  ;;  %v239_v5 = vpop.permute.xlu1 %238 }
  0xbc   : > { %1065 = vmatprep.subr.mxu0 %v243_v4 }
  0xbd   : > { %1066 = vmatpush3.msra.mxu0 %v243_v4 }
  0xbf   : > { %v241_v6 = vpop.permute.xlu0 %240  ;;  %v237_v7 = vpop.permute.xlu1 %236 }
  0xc0   : > { %1067 = vmatprep.subr.mxu0 %v241_v6 }
  0xc1   : > { %1068 = vmatpush3.msra.mxu0 %v241_v6 }
  0xc2   : > { %1069 = vmatprep.subr.mxu0 %v239_v5 }
  0xc3   : > { %1070 = vmatpush3.msra.mxu0 %v239_v5 }
  0xc4   : > { %1071 = vmatprep.subr.mxu0 %v237_v7 }
  0xc5   : > { %1072 = vmatpush3.msra.mxu0 %v237_v7 }
  0xc6   : > { %1074 = vmatmul.mubr.msk.f32.vlgmr.msra.gmra.mxu0 %vm248_vm0, %v1575_v1  ;;  %1079 = vmatprep.subr.mxu0 %v182_v8 }
  0xc7   : > { %1076 = vmatprep.mubr.msk.f32.mxu0 %vm248_vm0, %v1583_v3  ;;  %1080 = vmatpush3.msra.mxu0 %v182_v8 }
  0xca   : > { %1077 = vmatmul.mubr.msk.f32.gmra.mxu0 %vm248_vm0, %v1572_v0 }
 0x186   : > { %v1075_v21 = vpop.f32.mrf.mxu0 }
 0x188   : > { %v323_v22 = vpop.f32.mrf.mxu0 }
 0x189   : > { %1081 = vmatprep.mubr.msk.f32.mxu0 %vm346_vm1, %v323_v22  ;;  %v225_v22 = vld [vmem:[#allocation5 + $0x158] sm:$0xff] }
 0x18a   : > { %v1078_v23 = vpop.f32.mrf.mxu0  ;;  %1082 = vmatmul.mubr.msk.f32.vlgmr.msra.gmra.mxu0 %vm346_vm1, %v1075_v21  ;;  %v226_v21 = vld [vmem:[#allocation5 + $0x160] sm:$0xff] }
 0x18c   : > { %v333_v24 = vpop.f32.mrf.mxu0 }
 0x18d   : > { %1084 = vmatprep.mubr.msk.f32.mxu0 %vm346_vm1, %v333_v24  ;;  %v223_v24 = vld [vmem:[#allocation5 + $0x148] sm:$0xff] }
 0x18e   : > { %1085 = vmatmul.mubr.msk.f32.gmra.mxu0 %vm346_vm1, %v1078_v23  ;;  %v224_v23 = vld [vmem:[#allocation5 + $0x150] sm:$0xff] }
 0x18f   : > { %1133 = vmatprep.mubr.msk.f32.mxu0 %vm248_vm0, %v1580_v2  ;;  %v535_v2 = vsub.s32 1, %v1597_v30 }
 0x24a   : > { %v1083_v34 = vpop.f32.mrf.mxu0 }
 0x24b   : > { %v431_v35 = vadd.f32 %v1083_v34, %v345_v33 }
 0x24c   : > { %v425_v36 = vpop.f32.mrf.mxu0 }
 0x24d   : > { %v426_v37 = vadd.f32 %v425_v36, %v345_v33  ;;  %v445_v40 = vmax.f32 %v431_v35, 0.0 }
 0x24e   : > { %v1086_v38 = vpop.f32.mrf.mxu0 }
 0x24f   : > { %v444_v39 = vmax.f32 %v426_v37, 0.0  ;;  %v441_v41 = vadd.f32 %v1086_v38, %v345_v33  ;;  %v181_v37 = vld [vmem:[%s1561_s24 + $0x20] sm:$0xff] }
 0x250   : > { %v435_v42 = vpop.f32.mrf.mxu0  ;;  %v216_v38 = vld [vmem:[#allocation5 + $0x110] sm:$0xff] }
 0x251   : > { %v436_v43 = vadd.f32 %v435_v42, %v345_v33  ;;  %1119 = vmatprep.mubr.f32.mxu1 %v444_v39  ;;  %v447_v45 = vmax.f32 %v441_v41, 0.0  ;;  %v215_v39 = vld [vmem:[#allocation5 + $0x108] sm:$0xff] }
 0x252   : > { %1120 = vmatmul.mubr.f32.vlgmr.msra.gmra.mxu1 %v445_v40  ;;  %v713_v40 = vsub.s32 2, %v1597_v30 }
 0x253   : > { %v446_v44 = vmax.f32 %v436_v43, 0.0  ;;  %1189 = vmatpush3.msra.mxu1 %v230_v17 }
 0x254   : > { %1190 = vmatprep.subr.mxu1 %v1417_v16  ;;  %v714_v41 = vrot.slane %v1600_v32, %v713_v40 }
 0x255   : > { %1122 = vmatprep.mubr.f32.mxu1 %v446_v44  ;;  %1191 = vmatpush3.msra.mxu1 %v229_v18 }
 0x256   : > { %1123 = vmatmul.mubr.f32.gmra.mxu1 %v447_v45  ;;  %1192 = vmatprep.subr.mxu1 %v1417_v16  ;;  %v790_v45 = vsub.s32 3, %v1597_v30 }
 0x257   : > { %1220 = vmatprep.mubr.msk.f32.mxu1 %vm1418_vm2, %v1417_v16  ;;  %1193 = vmatpush3.msra.mxu1 %v228_v19 }
 0x258   : > { %1194 = vmatprep.subr.mxu1 %v1417_v16 }
 0x259   : > { %1195 = vmatpush3.msra.mxu1 %v227_v20 }
 0x25a   : > { %1196 = vmatprep.subr.mxu1 %v1417_v16 }
 0x25b   : > { %1197 = vmatpush3.msra.mxu1 %v226_v21 }
 0x25c   : > { %1198 = vmatprep.subr.mxu1 %v1417_v16 }
 0x25d   : > { %1199 = vmatpush3.msra.mxu1 %v225_v22 }
 0x25e   : > { %1200 = vmatprep.subr.mxu1 %v1417_v16 }
 0x25f   : > { %1201 = vmatpush3.msra.mxu1 %v224_v23 }
 0x260   : > { %1202 = vmatprep.subr.mxu1 %v1417_v16 }
 0x261   : > { %1203 = vmatpush3.msra.mxu1 %v223_v24 }
 0x262   : > { %1204 = vmatprep.subr.mxu1 %v1417_v16 }
 0x263   : > { %1205 = vmatpush3.msra.mxu1 %v222_v25 }
 0x264   : > { %1206 = vmatprep.subr.mxu1 %v1417_v16 }
 0x265   : > { %1207 = vmatpush3.msra.mxu1 %v221_v26 }
 0x266   : > { %1208 = vmatprep.subr.mxu1 %v1417_v16 }
 0x267   : > { %1209 = vmatpush3.msra.mxu1 %v220_v27 }
 0x268   : > { %1210 = vmatprep.subr.mxu1 %v1417_v16 }
 0x269   : > { %1211 = vmatpush3.msra.mxu1 %v219_v28 }
 0x26a   : > { %1212 = vmatprep.subr.mxu1 %v1417_v16 }
 0x26b   : > { %1213 = vmatpush3.msra.mxu1 %v218_v29 }
 0x26c   : > { %1214 = vmatprep.subr.mxu1 %v1417_v16 }
 0x26d   : > { %1215 = vmatpush3.msra.mxu1 %v217_v31 }
 0x26e   : > { %1216 = vmatprep.subr.mxu1 %v1417_v16 }
 0x26f   : > { %1217 = vmatpush3.msra.mxu1 %v216_v38 }
 0x270   : > { %1218 = vmatprep.subr.mxu1 %v1417_v16 }
 0x271   : > { %1219 = vmatpush3.msra.mxu1 %v215_v39 }
 0x312   : > { %v1121_v46 = vpop.f32.mrf.mxu1 }
 0x314   : > { %v514_v47 = vpop.f32.mrf.mxu1 }
 0x316   : > { %v1124_v48 = vpop.f32.mrf.mxu1 }
 0x317   : > { %1125 = vmatprep.subr.mxu0 %v1124_v48 }
 0x318   : > { %v524_v49 = vpop.f32.mrf.mxu1  ;;  %1126 = vmatpush3.msra.mxu0 %v1124_v48 }
 0x319   : > { %1127 = vmatprep.subr.mxu0 %v524_v49 }
 0x31a   : > { %1128 = vmatpush3.msra.mxu0 %v524_v49 }
 0x31b   : > { %1129 = vmatprep.subr.mxu0 %v1121_v46 }
 0x31c   : > { %1130 = vmatpush3.msra.mxu0 %v1121_v46  ;;  %v791_v46 = vrot.slane %v1600_v32, %v790_v45 }
 0x31d   : > { %1131 = vmatprep.subr.mxu0 %v514_v47 }
 0x31e   : > { %1132 = vmatpush3.msra.mxu0 %v514_v47 }
 0x31f   : > { %1134 = vmatmul.mubr.msk.f32.vlgmr.msra.gmra.mxu0 %vm248_vm0, %v1575_v1  ;;  %1139 = vmatprep.subr.mxu0 %v214_v50  ;;  %v199_v1 = vld [vmem:[#allocation5 + $0x88] sm:$0xff] }
 0x320   : > { %1136 = vmatprep.mubr.msk.f32.mxu0 %vm248_vm0, %v1583_v3  ;;  %1140 = vmatpush3.msra.mxu0 %v214_v50  ;;  %v536_v3 = vrot.slane %v1600_v32, %v535_v2 }
 0x321   : > { %1141 = vmatprep.subr.mxu0 %v213_v51 }
 0x322   : > { %1142 = vmatpush3.msra.mxu0 %v213_v51 }
 0x323   : > { %1137 = vmatmul.mubr.msk.f32.gmra.mxu0 %vm248_vm0, %v1572_v0  ;;  %1143 = vmatprep.subr.mxu0 %v212_v52  ;;  %v200_v0 = vld [vmem:[#allocation5 + $0x90] sm:$0xff] }
 0x324   : > { %1144 = vmatpush3.msra.mxu0 %v212_v52 }
 0x325   : > { %1145 = vmatprep.subr.mxu0 %v211_v53 }
 0x326   : > { %1146 = vmatpush3.msra.mxu0 %v211_v53 }
 0x327   : > { %1147 = vmatprep.subr.mxu0 %v210_v54 }
 0x328   : > { %1148 = vmatpush3.msra.mxu0 %v210_v54 }
 0x329   : > { %1149 = vmatprep.subr.mxu0 %v209_v55 }
 0x32a   : > { %1150 = vmatpush3.msra.mxu0 %v209_v55 }
 0x32b   : > { %1151 = vmatprep.subr.mxu0 %v208_v56 }
 0x32c   : > { %1152 = vmatpush3.msra.mxu0 %v208_v56 }
 0x32d   : > { %1153 = vmatprep.subr.mxu0 %v207_v57 }
 0x32e   : > { %1154 = vmatpush3.msra.mxu0 %v207_v57 }
 0x32f   : > { %1155 = vmatprep.subr.mxu0 %v206_v58 }
 0x330   : > { %1156 = vmatpush3.msra.mxu0 %v206_v58 }
 0x331   : > { %1157 = vmatprep.subr.mxu0 %v205_v59 }
 0x332   : > { %1158 = vmatpush3.msra.mxu0 %v205_v59 }
 0x333   : > { %1159 = vmatprep.subr.mxu0 %v204_v60 }
 0x334   : > { %1160 = vmatpush3.msra.mxu0 %v204_v60 }
 0x335   : > { %1161 = vmatprep.subr.mxu0 %v203_v61 }
 0x336   : > { %1162 = vmatpush3.msra.mxu0 %v203_v61 }
 0x337   : > { %1163 = vmatprep.subr.mxu0 %v202_v62 }
 0x338   : > { %1164 = vmatpush3.msra.mxu0 %v202_v62 }
 0x339   : > { %1165 = vmatprep.subr.mxu0 %v201_v63 }
 0x33a   : > { %1166 = vmatpush3.msra.mxu0 %v201_v63 }
 0x33b   : > { %1167 = vmatprep.subr.mxu0 %v200_v0 }
 0x33c   : > { %1168 = vmatpush3.msra.mxu0 %v200_v0 }
 0x33d   : > { %1169 = vmatprep.subr.mxu0 %v199_v1 }
 0x33e   : > { %1170 = vmatpush3.msra.mxu0 %v199_v1 }
 0x33f   : > { %1177 = vmatprep.subr.mxu0 %v1417_v16 }
 0x3df   : > { %v1135_v4 = vpop.f32.mrf.mxu0 }
 0x3e0   : > { %v609_v5 = vadd.f32 %v1135_v4, %v536_v3 }
 0x3e1   : > { %v603_v6 = vpop.f32.mrf.mxu0 }
 0x3e2   : > { %v604_v7 = vadd.f32 %v603_v6, %v536_v3  ;;  %v623_v10 = vmax.f32 %v609_v5, 0.0 }
 0x3e3   : > { %v1138_v8 = vpop.f32.mrf.mxu0 }
 0x3e4   : > { %v622_v9 = vmax.f32 %v604_v7, 0.0  ;;  %v619_v11 = vadd.f32 %v1138_v8, %v536_v3 }
 0x3e5   : > { %v613_v12 = vpop.f32.mrf.mxu0 }
 0x3e6   : > { %v614_v13 = vadd.f32 %v613_v12, %v536_v3  ;;  %1171 = vmatprep.mubr.f32.mxu0 %v622_v9  ;;  %v625_v15 = vmax.f32 %v619_v11, 0.0 }
 0x3e7   : > { %1172 = vmatmul.mubr.f32.vlgmr.msra.gmra.mxu0 %v623_v10 }
 0x3e8   : > { %v624_v14 = vmax.f32 %v614_v13, 0.0 }
 0x3ea   : > { %1174 = vmatprep.mubr.f32.mxu0 %v624_v14 }
 0x3eb   : > { %1175 = vmatmul.mubr.f32.gmra.mxu0 %v625_v15 }
 0x3ec   : > { %1185 = vmatprep.mubr.msk.f32.mxu0 %vm1418_vm2, %v1417_v16 }
 0x4a7   : > { %v1173_v33 = vpop.f32.mrf.mxu0 }
 0x4a9   : > { %v692_v34 = vpop.f32.mrf.mxu0 }
 0x4ab   : > { %v1176_v35 = vpop.f32.mrf.mxu0 }
 0x4ac   : > { %1178 = vmatpush3.msra.mxu0 %v1176_v35 }
 0x4ad   : > { %v702_v36 = vpop.f32.mrf.mxu0  ;;  %1179 = vmatprep.subr.mxu0 %v1417_v16 }
 0x4ae   : > { %1180 = vmatpush3.msra.mxu0 %v702_v36 }
 0x4af   : > { %1181 = vmatprep.subr.mxu0 %v1417_v16 }
 0x4b0   : > { %1182 = vmatpush3.msra.mxu0 %v1173_v33 }
 0x4b1   : > { %1183 = vmatprep.subr.mxu0 %v1417_v16 }
 0x4b2   : > { %1184 = vmatpush3.msra.mxu0 %v692_v34 }
 0x4b3   : > { %1186 = vmatmul.mubr.msk.f32.vlgmr.msra.gmra.mxu0 %vm248_vm0, %v181_v37 }
 0x573   : > { %v784_v42 = vpop.f32.mrf.mxu0 }
 0x574   : > { %v785_v43 = vadd.f32 %v784_v42, %v714_v41 }
 0x575   : > { %v1187_v44 = vpop.f32.mrf.mxu0 }
 0x576   : > { %1221 = vmatmul.mubr.f32.vlgmr.msra.gmra.mxu1 %v785_v43 }
 0x636   : > { %v858_v47 = vpop.f32.mrf.mxu1 }
 0x637   : > { %v859_v48 = vadd.f32 %v858_v47, %v791_v46 }
 0x638   : > { %v1222_v49 = vpop.f32.mrf.mxu1 }
 0x639   : > { %862 = vst [vmem:[%s176_s26] sm:$0xff] %v859_v48 }
 0x63a   : > { %1355 = shalt.err (!%p1352_p0)
}
 0x63b   : > { %s1356_s5 = scalar_lea.hbm %s1622_s20, 128  ;;  %s1360_s18 = scalar_lea.hbm %s1661_s2, 256 }
 0x63c   : > { %p1357_p11 = scmp.ne.s32.totalorder %s1622_s20, %s1356_s5  ;;  %p1361_p4 = scmp.lt.s32.totalorder %s1622_s20, %s1661_s2 }
 0x63d   : > { %p1362_p6 = scmp.lt.s32.totalorder %s1360_s18, %s1356_s5 }
 0x63e   : > { %p1358_p2 = pnand %p1357_p11, %p1677_p5 }
 0x63f   : > { %p1363_p8 = por %p1362_p6, %p1361_p4 }
 0x640   : > { %p1359_p1 = pneg %p1358_p2 }
 0x642   : > { %p1364_p3 = pnand %p1363_p8, %p1359_p1 }
 0x644   : > { %1367 = shalt.err (!%p1364_p3)
}
 0x645   : > { %1232 = dma.vmem_to_hbm [thread:$0]  (%p1677_p5), %s878_s6, 128, %s1622_s20, %s864_s27  }
 0x646 PF: > { %s889_s24 = sand.u32 1, %s1398_s9   ;;  %p1678_p7 = scmp.ne.s32.totalorder %s1667_s16, 0 }
 0x647   : > { %p1679_p9 = scmp.ge.s32.totalorder %s1410_s12, 2  ;;  %s890_s17 = scalar_lea.sflag [#allocation4], %s889_s24 }
 0x649   : > { %p1243_p10 = pnand %p1679_p9, %p1678_p7 }
 0x64b   : > { %p1244_p12 = pneg %p1243_p10 }
 0x64d   : > { %1393 = dma.done.wait (%p1244_p12), %s890_s17, 128  }
 0x64e   : > { %1395 = vsyncadd (%p1244_p12), %s890_s17, 4294967168  ;;  %p16_p13 = scmp.ge.s32.totalorder %s1489_s21, 4   ;;  %s1680_s9 = smov %s1402_s10 }
 0x64f   : > { %s1681_s10 = smov %s1406_s11  ;;  %s1682_s11 = smov %s1509_s29 }
 0x650   : > { %s1683_s12 = smov %s1489_s21  ;;  %18 = sbr.rel (!%p16_p13) target bundleno = 6 (0x6), region = 77 }
 0x655   :  { %895 = vsyncpa [#allocation3], 1 }
 0x656   :  { %897 = vsyncpa [#allocation3 + $0x1], 1 }
 0x657   :  { %898 = vsyncpa [#allocation6], 1 }
 0x658   :  { %899 = vsyncpa [#allocation4], 1 }
 0x659   :  { %901 = vsyncpa [#allocation4 + $0x1], 1 }

</bundles_post_ra>
